<compile_context>
chip_gen: v6e
topology: v6e:2x2x1
jax: 0.10.0
libtpu: 0.0.40
codegen_flags: <defaults>
</compile_context>

<pallas_src>
import math

import jax
import jax.numpy as jnp
from jax.experimental import pallas as pl
from jax.experimental.pallas import tpu as pltpu


def gating_kernel(x_ref, w1_ref, b1_ref, w2_ref, b2_ref, o_ref):
    # x tile: (TB, C). Weights (already bf16) are VMEM-resident across grid steps.
    x = x_ref[...].astype(jnp.bfloat16)  # no-op if the caller already supplies bf16

    # fc1 + ReLU  (bf16 MXU feed, f32 accumulate, f32 elementwise)
    h = jnp.dot(x, w1_ref[...], preferred_element_type=jnp.float32) + b1_ref[...]
    h = jnp.maximum(h, 0.0)

    # fc2
    logits = (
        jnp.dot(h.astype(jnp.bfloat16), w2_ref[...], preferred_element_type=jnp.float32)
        + b2_ref[...]
    )

    # Numerically stable softmax over last dim (matches torch.nn.Softmax(dim=-1)).
    m = jnp.max(logits, axis=-1, keepdims=True)
    e = jnp.exp(logits - m)
    s = jnp.sum(e, axis=-1, keepdims=True)
    o_ref[...] = (e / s).astype(o_ref.dtype)  # exact normalization; E is tiny


def _round_up(x, m):
    return ((x + m - 1) // m) * m


def _bytes_per_row(C, H, E, x_itemsize):
    # Per-batch-row VMEM: double-buffered x + out blocks, plus in-kernel intermediates
    # (bf16 x copy, f32 h, bf16 h, f32 logits, f32 exp).
    return (
        2 * C * x_itemsize   # x block, double-buffered
        + 2 * E * 4          # out block, double-buffered
        + C * 2              # bf16 x
        + H * 4 + H * 2      # f32 h + bf16 h
        + 2 * E * 4          # logits + exp
    )


def _choose_tile_b(B_pad, C, H, E, x_itemsize, vmem_budget_bytes=8 * 1024 * 1024):
    bpr = _bytes_per_row(C, H, E, x_itemsize)
    tb_cap = max(8, (vmem_budget_bytes // bpr) // 8 * 8)
    tb_cap = min(tb_cap, 1024)  # 512-1024 already ~HBM roofline; avoid spill pressure

    n_units = B_pad // 8  # batch measured in 8-row sublane units
    # Prefer >=4 grid steps (pipelining + even v7x 2-TC split), else >=2, else 1.
    if n_units >= 4:
        tb_cap = min(tb_cap, (n_units // 4) * 8)
    elif n_units >= 2:
        tb_cap = min(tb_cap, (n_units // 2) * 8)
    tb_cap = max(tb_cap, 8)

    # Largest divisor of B_pad (in 8-row units) not exceeding the cap -> zero extra pad.
    best = 8
    for u in range(1, n_units + 1):
        if n_units % u == 0 and u * 8 <= tb_cap:
            best = u * 8
    return best


def gating_network(context, w1, b1, w2, b2, *, tile_b=None):
    """context: (B, C). Returns (B, num_experts) float32 softmax gates."""
    B, C = context.shape
    H = w1.shape[1]
    E = w2.shape[1]

    # One-time weight cast to bf16 (tiny, VMEM-resident); biases stay f32 for the epilogue.
    w1_bf = w1.astype(jnp.bfloat16)
    w2_bf = w2.astype(jnp.bfloat16)
    b1_f = b1.astype(jnp.float32)
    b2_f = b2.astype(jnp.float32)

    # Pad batch only to sublane granularity (8 rows), never to a full tile: avoids
    # rewriting the whole (B, C) stream in HBM just to round the grid.
    B_pad = _round_up(B, 8)
    if B_pad != B:
        context = jnp.pad(context, ((0, B_pad - B), (0, 0)))

    x_itemsize = jnp.dtype(context.dtype).itemsize
    if tile_b is None:
        tile_b = _choose_tile_b(B_pad, C, H, E, x_itemsize)
    assert B_pad % tile_b == 0, (B_pad, tile_b)
    n_steps = B_pad // tile_b

    # Right-sized scoped-VMEM limit (counts intermediates + resident weights), generous floor.
    est = (
        tile_b * _bytes_per_row(C, H, E, x_itemsize)
        + 2 * (C * H * 2 + H * 4 + H * E * 2 + E * 4)
    )
    vmem_limit = int(min(64 * 1024 * 1024, max(8 * 1024 * 1024, 2 * est)))

    # Deeper pipelining for the activation stream when tiles are small and the grid is deep.
    if n_steps >= 3 and tile_b <= 256:
        x_spec = pl.BlockSpec((tile_b, C), lambda i: (i, 0), pipeline_mode=pl.Buffered(3))
    else:
        x_spec = pl.BlockSpec((tile_b, C), lambda i: (i, 0))

    out = pl.pallas_call(
        gating_kernel,
        out_shape=jax.ShapeDtypeStruct((B_pad, E), jnp.float32),
        grid=(n_steps,),
        in_specs=[
            x_spec,                                      # streamed activations
            pl.BlockSpec((C, H), lambda i: (0, 0)),      # resident fc1 weight (bf16)
            pl.BlockSpec((1, H), lambda i: (0, 0)),      # resident fc1 bias (f32)
            pl.BlockSpec((H, E), lambda i: (0, 0)),      # resident fc2 weight (bf16)
            pl.BlockSpec((1, E), lambda i: (0, 0)),      # resident fc2 bias (f32)
        ],
        out_specs=pl.BlockSpec((tile_b, E), lambda i: (i, 0)),
        compiler_params=pltpu.CompilerParams(
            # Batch tiles are independent -> shard across TCs on v7x megacore.
            dimension_semantics=("parallel",),
            vmem_limit_bytes=vmem_limit,
        ),
    )(context, w1_bf, b1_f, w2_bf, b2_f)

    return out[:B] if B_pad != B else out


def init_params(key, context_size, num_experts, hidden=64):
    # Deterministic init mimicking torch.nn.Linear default (uniform +-1/sqrt(fan_in)).
    k1, k2, k3, k4 = jax.random.split(key, 4)
    bound1 = 1.0 / math.sqrt(context_size)
    bound2 = 1.0 / math.sqrt(hidden)
    w1 = jax.random.uniform(k1, (context_size, hidden), jnp.float32, -bound1, bound1)
    b1 = jax.random.uniform(k2, (1, hidden), jnp.float32, -bound1, bound1)
    w2 = jax.random.uniform(k3, (hidden, num_experts), jnp.float32, -bound2, bound2)
    b2 = jax.random.uniform(k4, (1, num_experts), jnp.float32, -bound2, bound2)
    return w1, b1, w2, b2


if __name__ == "__main__":
    context_size = 32
    num_experts = 8
    batch = 8

    key = jax.random.PRNGKey(0)
    kx, kp = jax.random.split(key)
    context = jax.random.normal(kx, (batch, context_size), jnp.float32)
    w1, b1, w2, b2 = init_params(kp, context_size, num_experts)

    gates = gating_network(context, w1, b1, w2, b2)
    gates = jax.block_until_ready(gates)

    # Reference check in plain JAX (f32); kernel feeds MXU in bf16 -> loose tolerance,
    # but normalization is exact so row sums are ~1 to fp32 precision.
    h_ref = jnp.maximum(context @ w1 + b1, 0.0)
    ref = jax.nn.softmax(h_ref @ w2 + b2, axis=-1)
    assert gates.shape == (batch, num_experts)
    assert jnp.allclose(gates, ref, atol=2e-2), "mismatch vs reference"
    assert jnp.allclose(jnp.sum(gates, axis=-1), 1.0, atol=1e-5)

    print("KERNEL_OK")
</pallas_src>

<mosaic_0001>
module attributes {stable_mosaic.version = 11 : i64} {
  func.func @gating_kernel(%arg0: i32, %arg1: memref<8x32xf32, #tpu.memory_space<vmem>>, %arg2: memref<32x64xbf16, #tpu.memory_space<vmem>>, %arg3: memref<1x64xf32, #tpu.memory_space<vmem>>, %arg4: memref<64x8xbf16, #tpu.memory_space<vmem>>, %arg5: memref<1x8xf32, #tpu.memory_space<vmem>>, %arg6: memref<8x8xf32, #tpu.memory_space<vmem>>) attributes {dimension_semantics = [#tpu.dimension_semantics<parallel>], iteration_bounds = array<i64: 1>, scalar_prefetch = 0 : i64, scratch_operands = 0 : i64, tpu.core_type = #tpu.core_type<tc>, window_params = [{transform_indices = @transform_0, window_bounds = array<i64: 8, 32>}, {pipeline_mode = #tpu.pipeline_mode<synchronous>, transform_indices = @transform_1, window_bounds = array<i64: 32, 64>}, {pipeline_mode = #tpu.pipeline_mode<synchronous>, transform_indices = @transform_2, window_bounds = array<i64: 1, 64>}, {pipeline_mode = #tpu.pipeline_mode<synchronous>, transform_indices = @transform_3, window_bounds = array<i64: 64, 8>}, {pipeline_mode = #tpu.pipeline_mode<synchronous>, transform_indices = @transform_4, window_bounds = array<i64: 1, 8>}, {transform_indices = @transform_5, window_bounds = array<i64: 8, 8>}]} {
    %c0 = arith.constant 0 : index
    %c0_0 = arith.constant 0 : index
    %0 = vector.load %arg1[%c0, %c0_0] : memref<8x32xf32, #tpu.memory_space<vmem>>, vector<8x32xf32>
    %1 = arith.truncf %0 : vector<8x32xf32> to vector<8x32xbf16>
    %c0_1 = arith.constant 0 : index
    %c0_2 = arith.constant 0 : index
    %2 = vector.load %arg2[%c0_1, %c0_2] : memref<32x64xbf16, #tpu.memory_space<vmem>>, vector<32x64xbf16>
    %cst = arith.constant dense<0.000000e+00> : vector<8x64xf32>
    %3 = tpu.matmul %1, %2, %cst {dimension_numbers = #tpu.dot_dimension_numbers<[1], [0], [0], [1], [0, 0, 1, 1], [], []>} : vector<8x32xbf16>, vector<32x64xbf16>, vector<8x64xf32> -> vector<8x64xf32>
    %c0_3 = arith.constant 0 : index
    %c0_4 = arith.constant 0 : index
    %4 = vector.load %arg3[%c0_3, %c0_4] : memref<1x64xf32, #tpu.memory_space<vmem>>, vector<1x64xf32>
    %5 = vector.broadcast %4 : vector<1x64xf32> to vector<8x64xf32>
    %6 = arith.addf %3, %5 : vector<8x64xf32>
    %cst_5 = arith.constant 0.000000e+00 : f32
    %7 = vector.broadcast %cst_5 : f32 to vector<8x64xf32>
    %8 = arith.maximumf %6, %7 : vector<8x64xf32>
    %9 = arith.truncf %8 : vector<8x64xf32> to vector<8x64xbf16>
    %c0_6 = arith.constant 0 : index
    %c0_7 = arith.constant 0 : index
    %10 = vector.load %arg4[%c0_6, %c0_7] : memref<64x8xbf16, #tpu.memory_space<vmem>>, vector<64x8xbf16>
    %cst_8 = arith.constant dense<0.000000e+00> : vector<8x8xf32>
    %11 = tpu.matmul %9, %10, %cst_8 {dimension_numbers = #tpu.dot_dimension_numbers<[1], [0], [0], [1], [0, 0, 1, 1], [], []>} : vector<8x64xbf16>, vector<64x8xbf16>, vector<8x8xf32> -> vector<8x8xf32>
    %c0_9 = arith.constant 0 : index
    %c0_10 = arith.constant 0 : index
    %12 = vector.load %arg5[%c0_9, %c0_10] : memref<1x8xf32, #tpu.memory_space<vmem>>, vector<1x8xf32>
    %13 = vector.broadcast %12 : vector<1x8xf32> to vector<8x8xf32>
    %14 = arith.addf %11, %13 : vector<8x8xf32>
    %cst_11 = arith.constant dense<0xFF800000> : vector<8xf32>
    %15 = vector.multi_reduction <maximumf>, %14, %cst_11 [1] : vector<8x8xf32> to vector<8xf32>
    %16 = vector.shape_cast %15 : vector<8xf32> to vector<8x1xf32>
    %17 = vector.broadcast %16 : vector<8x1xf32> to vector<8x8xf32>
    %18 = arith.subf %14, %17 : vector<8x8xf32>
    %19 = math.exp %18 : vector<8x8xf32>
    %cst_12 = arith.constant dense<0.000000e+00> : vector<8xf32>
    %20 = vector.multi_reduction <add>, %19, %cst_12 [1] : vector<8x8xf32> to vector<8xf32>
    %21 = vector.shape_cast %20 : vector<8xf32> to vector<8x1xf32>
    %22 = vector.broadcast %21 : vector<8x1xf32> to vector<8x8xf32>
    %23 = arith.divf %19, %22 : vector<8x8xf32>
    %c0_13 = arith.constant 0 : index
    %c0_14 = arith.constant 0 : index
    %24 = vector.load %arg6[%c0_13, %c0_14] : memref<8x8xf32, #tpu.memory_space<vmem>>, vector<8x8xf32>
    tpu.vector_store %arg6[%c0_13, %c0_14], %23 {strides = array<i32>} : memref<8x8xf32, #tpu.memory_space<vmem>>, vector<8x8xf32>,
    return
  }
  func.func @transform_0(%arg0: i32) -> (i32, i32) {
    %c0_i32 = arith.constant 0 : i32
    %c0_i32_0 = arith.constant 0 : i32
    return %arg0, %c0_i32 : i32, i32
  }
  func.func @transform_1(%arg0: i32) -> (i32, i32) {
    %c0_i32 = arith.constant 0 : i32
    %c0_i32_0 = arith.constant 0 : i32
    %c0_i32_1 = arith.constant 0 : i32
    return %c0_i32, %c0_i32_0 : i32, i32
  }
  func.func @transform_2(%arg0: i32) -> (i32, i32) {
    %c0_i32 = arith.constant 0 : i32
    %c0_i32_0 = arith.constant 0 : i32
    %c0_i32_1 = arith.constant 0 : i32
    return %c0_i32, %c0_i32_0 : i32, i32
  }
  func.func @transform_3(%arg0: i32) -> (i32, i32) {
    %c0_i32 = arith.constant 0 : i32
    %c0_i32_0 = arith.constant 0 : i32
    %c0_i32_1 = arith.constant 0 : i32
    return %c0_i32, %c0_i32_0 : i32, i32
  }
  func.func @transform_4(%arg0: i32) -> (i32, i32) {
    %c0_i32 = arith.constant 0 : i32
    %c0_i32_0 = arith.constant 0 : i32
    %c0_i32_1 = arith.constant 0 : i32
    return %c0_i32, %c0_i32_0 : i32, i32
  }
  func.func @transform_5(%arg0: i32) -> (i32, i32) {
    %c0_i32 = arith.constant 0 : i32
    %c0_i32_0 = arith.constant 0 : i32
    return %arg0, %c0_i32 : i32, i32
  }
}

</mosaic_0001>

<bundles_post_ra>
// kernel: tpu_custom_call.1
= control target key start
LH: loop header
LB: loop body
LE: loop exit
PB: predicated region body
PF: predicated region fallthrough
CT: control target
= control target key end

     0   :  { %v276_v1 = vmov 0.0   ;;  %vm277_vm0 = vmmov 0   ;;  %vm47_vm1 = vcmask 261120   ;;  %s342_s0 = inlined_call_operand.vmem [shape: f32[8,32], index: 0, kind: input, shape index: {}]   ;;  %s343_s1 = inlined_call_operand.vmem [shape: bf16[32,64], index: 1, kind: input, shape index: {}]   ;;  %s344_s2 = inlined_call_operand.vmem [shape: f32[1,64], index: 2, kind: input, shape index: {}]   ;;  %s345_s3 = inlined_call_operand.vmem [shape: bf16[64,8], index: 3, kind: input, shape index: {}]   ;;  %s346_s4 = inlined_call_operand.vmem [shape: f32[1,8], index: 4, kind: input, shape index: {}]   ;;  %s347_s5 = inlined_call_operand.hbm [shape: f32[8,8], index: 5, kind: output, shape index: {}]  }
   0x1   :  { %v244_v0 = vld [vmem:[%s343_s1 + $0x8] sm:$0xff]   ;;  %221 = vmatprep.subr.bf16.mxu0 %v276_v1  ;;  %v245_v2 = vld [vmem:[%s343_s1] sm:$0xff]   ;;  %229 = vmatprep.subr.bf16.mxu1 %v276_v1  ;;  %v246_v4 = vld [vmem:[%s345_s3 + $0x18] sm:$0xff]  }
   0x2   :  { %222 = vmatpush3.bf16.msra.mxu0 %v244_v0  ;;  %225 = vmatprep.mubr.msk.bf16.mxu0 %vm277_vm0, %v276_v1  ;;  %v22_v3 = vld [vmem:[%s342_s0] sm:$0xff]  ;;  %v247_v5 = vld [vmem:[%s345_s3 + $0x10] sm:$0xff]  }
   0x3   :  { %223 = vmatprep.subr.bf16.mxu0 %v276_v1  ;;  %237 = vmatprep.mubr.msk.bf16.mxu1 %vm277_vm0, %v276_v1  ;;  %v23_v6 = vpack.c.bf16 %v22_v3, %v22_v3 }
   0x4   :  { %230 = vmatpush3.bf16.msra.mxu1 %v246_v4 }
   0x5   :  { %231 = vmatprep.subr.bf16.mxu1 %v276_v1 }
   0x6   :  { %224 = vmatpush3.bf16.msra.mxu0 %v245_v2 }
   0x7   :  { %10 = vsyncpa [#allocation3], 0  ;;  %v248_v7 = vld [vmem:[%s345_s3 + $0x8] sm:$0xff]   ;;  %v249_v8 = vld [vmem:[%s345_s3] sm:$0xff]   ;;  %vm132_vm2 = vcmask 523264   ;;  %vm176_vm3 = vcmask 64512  }
   0x8   :  { %232 = vmatpush3.bf16.msra.mxu1 %v247_v5  ;;  %v203_v9 = vld [vmem:[%s344_s2] ss:$0 sm:$0xff]  ;;  %s278_s2 = smov [#allocation2]  }
   0x9   :  { %226 = vmatmul.mubr.msk.bf16.vlgmr.msra.gmra.mxu0 %vm47_vm1, %v23_v6  ;;  %233 = vmatprep.subr.bf16.mxu1 %v276_v1  ;;  %v207_v17 = vld [vmem:[%s346_s4] ss:$0 sm:$0xff]  ;;  %s195_s3 = sshll.u32 %s278_s2, 4  ;;  %s196_s3 = int_to_ptr.vmem [resolvable:$true] %s195_s3 }
   0xa   :  { %s254_s4 = scalar_lea.vmem %s196_s3, 128  ;;  %p259_p1 = scmp.lt.s32.totalorder %s196_s3, %s196_s3 }
   0xb   :  { %p255_p0 = scmp.ne.s32.totalorder %s196_s3, %s254_s4  ;;  %p260_p2 = scmp.lt.s32.totalorder %s254_s4, %s254_s4 }
   0xc   :  { %234 = vmatpush3.bf16.msra.mxu1 %v248_v7 }
   0xd   :  { %235 = vmatprep.subr.bf16.mxu1 %v276_v1  ;;  %p261_p3 = por %p260_p2, %p259_p1 }
   0xf   :  { %p262_p4 = pnand %p261_p3, %p255_p0 }
  0x10   :  { %236 = vmatpush3.bf16.msra.mxu1 %v249_v8 }
  0xc9   :  { %v85_v10 = vpop.f32.mrf.mxu0 }
  0xca   :  { %v86_v11 = vadd.f32 %v203_v9, %v85_v10 }
  0xcb   :  { %v227_v12 = vpop.f32.mrf.mxu0 }
  0xcc   :  { %v91_v13 = vmax.f32 %v86_v11, 0.0 }
  0xcd   :  { %v88_v14 = vpop.f32.mrf.mxu0 }
  0xce   :  { %v92_v15 = vpack.c.bf16 %v91_v13, %v91_v13 }
  0xcf   :  { %v228_v16 = vpop.f32.mrf.mxu0 }
  0xd0   :  { %238 = vmatmul.mubr.msk.bf16.vlgmr.msra.gmra.mxu1 %vm132_vm2, %v92_v15 }
 0x190   :  { %v170_v18 = vpop.f32.mrf.mxu1 }
 0x191   :  { %v171_v19 = vadd.f32 %v207_v17, %v170_v18 }
 0x192   :  { %v239_v20 = vpop.f32.mrf.mxu1 }
 0x193   :  { %v177_v21 = vsel %vm176_vm3, %v171_v19, -inf }
 0x194   :  { %178 = vmax.xlane.f32.xlu0 %v177_v21  ;;  %v173_v22 = vpop.f32.mrf.mxu1 }
 0x196   :  { %v240_v23 = vpop.f32.mrf.mxu1 }
 0x21d   :  { %v179_v24 = vpop.xlane.xlu0 %178 }
 0x21e   :  { %v180_v25 = vsub.f32 %v171_v19, %v179_v24 }
 0x220   :  { %v181_v26 = vmul.f32 1.442695, %v180_v25 }
 0x222   :  { %250 = vpow2.f32 %v181_v26 }
 0x22f   :  { %v251_v27 = vpop.eup %250 }
 0x230   :  { %v183_v28 = vsel %vm176_vm3, %v251_v27, 0.0 }
 0x231   :  { %184 = vadd.xlane.f32.xlu0 %v183_v28 }
 0x2ba   :  { %v185_v29 = vpop.xlane.xlu0 %184 }
 0x2bb   :  { %252 = vrcp.f32 %v185_v29 }
 0x2c8   :  { %v253_v30 = vpop.eup %252 }
 0x2c9   :  { %v187_v31 = vmul.f32 %v253_v30, %v251_v27 }
 0x2cb   :  { %188 = vst.msk [vmem:[#allocation2] sm:$0xff] %vm176_vm3, %v187_v31 }
 0x2cc   :  { %265 = shalt.err (!%p262_p4)
}
 0x2cd   :  { %198 = dma.vmem_to_hbm [thread:$0]  %s196_s3, 128, %s347_s5, [#allocation3]  }
 0x2ce   :  { %274 = dma.done.wait [#allocation3], 128  }
 0x2cf   :  { %275 = vsyncadd [#allocation3], 4294967168 }
 0x2d0   :  { %202 = vsyncpa [#allocation3], 1 }

</bundles_post_ra>
